<compile_context>
chip_gen: v7x
topology: tpu7x:2x2x1
jax: 0.10.0
libtpu: 0.0.40
codegen_flags: <defaults>
</compile_context>

<pallas_src>
import functools

import jax
import jax.numpy as jnp
from jax.experimental import pallas as pl
from jax.experimental.pallas import tpu as pltpu


def _round_up(x, m):
    return ((x + m - 1) // m) * m


# Budget (bytes) under which the fused adjacency-resident path is used.
# Conservative for v7x's 64 MiB per-TC VMEM (double-buffer accounting below).
_FUSED_VMEM_BUDGET = 40 << 20


def _choose_tiling(n):
    """Pick (padded N, row-tile TM, reduction-tile TK) for the A @ E matmul."""
    if n <= 512:
        n_pad = _round_up(n, 128)
        return n_pad, n_pad, n_pad
    if n <= 2048:
        n_pad = _round_up(n, 512)
        return n_pad, 256, 512
    # Large graphs: 512x1024 bf16 adjacency tiles (1 MiB each, 2 MiB when
    # double-buffered) leave ample headroom even under v7x's 64 MiB VMEM.
    n_pad = _round_up(n, 1024)
    return n_pad, 512, 1024


def _fused_footprint_bytes(n_pad, dp):
    """Double-buffered VMEM footprint of the fused (adjacency-resident) path."""
    return (2 * n_pad * n_pad * 2   # adjacency block (bf16), 2 pipeline bufs
            + 2 * n_pad * dp * 4    # ego input (f32)
            + 2 * n_pad * dp * 4    # running-sum output (f32)
            + n_pad * dp * 2)       # bf16 current-layer scratch


# ---------------------------------------------------------------------------
# Fused path: all layers in one pallas_call, adjacency resident in VMEM.
# ---------------------------------------------------------------------------
def _lgcn_fused_kernel(adj_ref, ego_ref, out_ref, cur_ref, *, inv_scale):
    """Grid axis = layer index l.  Everything stays resident across layers.

        cur_{l+1} = A @ cur_l        (bf16 operands, f32 MXU accumulation)
        out      += cur_{l+1}        (f32 running LightGCN sum)
        out      *= inv_scale        (on the last layer: the mean)
    """
    layer = pl.program_id(0)

    @pl.when(layer == 0)
    def _init():
        ego = ego_ref[...]
        out_ref[...] = ego                       # layer-0 term of the sum
        cur_ref[...] = ego.astype(cur_ref.dtype)

    nxt = jnp.dot(adj_ref[...], cur_ref[...],
                  preferred_element_type=jnp.float32)
    out_ref[...] += nxt
    cur_ref[...] = nxt.astype(cur_ref.dtype)

    @pl.when(layer == pl.num_programs(0) - 1)
    def _finalize():
        out_ref[...] *= inv_scale


def _lgcn_fused(adj_p, ego_p, *, n_layers):
    n_pad, dp = ego_p.shape
    inv = 1.0 / float(n_layers + 1)

    vmem_limit = min(_fused_footprint_bytes(n_pad, dp) + (8 << 20), 64 << 20)
    cost = pl.CostEstimate(
        flops=2 * n_layers * n_pad * n_pad * dp,
        transcendentals=0,
        bytes_accessed=(n_pad * n_pad * 2      # adjacency streamed ONCE
                        + n_pad * dp * 4       # ego in
                        + n_pad * dp * 4),     # mean out
    )

    kernel = functools.partial(_lgcn_fused_kernel, inv_scale=inv)
    return pl.pallas_call(
        kernel,
        out_shape=jax.ShapeDtypeStruct((n_pad, dp), jnp.float32),
        grid_spec=pltpu.PrefetchScalarGridSpec(
            num_scalar_prefetch=0,
            grid=(n_layers,),
            in_specs=[
                pl.BlockSpec((n_pad, n_pad), lambda l: (0, 0)),  # A (resident)
                pl.BlockSpec((n_pad, dp), lambda l: (0, 0)),     # ego
            ],
            out_specs=pl.BlockSpec((n_pad, dp), lambda l: (0, 0)),
            scratch_shapes=[pltpu.VMEM((n_pad, dp), jnp.bfloat16)],
        ),
        compiler_params=pltpu.CompilerParams(
            dimension_semantics=("arbitrary",),
            vmem_limit_bytes=int(vmem_limit),
        ),
        cost_estimate=cost,
    )(adj_p, ego_p)


# ---------------------------------------------------------------------------
# Tiled path: one pallas_call per layer, row-tile x K-tile MXU matmul.
# ---------------------------------------------------------------------------
def _lgcn_layer_kernel(adj_ref, e_ref, acc_in_ref, next_ref, acc_out_ref,
                       mm_ref, *, inv_scale):
    """One LightGCN layer, one (row-tile, K-tile) grid step.

        next    = A @ E_l                       (bf16 out, f32 accumulation)
        acc_out = (acc_in + next) * inv_scale   (f32 running layer sum)
    """
    k = pl.program_id(1)

    @pl.when(k == 0)
    def _init():
        mm_ref[...] = jnp.zeros_like(mm_ref)

    mm_ref[...] += jnp.dot(adj_ref[...], e_ref[...],
                           preferred_element_type=jnp.float32)

    @pl.when(k == pl.num_programs(1) - 1)
    def _finalize():
        nxt = mm_ref[...]
        next_ref[...] = nxt.astype(next_ref.dtype)
        acc_out_ref[...] = ((acc_in_ref[...] + nxt) * inv_scale).astype(
            acc_out_ref.dtype)


def _lgcn_layer(adj_p, cur, acc, *, tm, tk, inv_scale):
    n_pad, dp = cur.shape
    grid = (n_pad // tm, n_pad // tk)

    # Double-buffered tile footprint (bytes) + headroom for the VMEM limit.
    tile_bytes = (2 * tm * tk * 2      # adjacency tile (bf16)
                  + 2 * tk * dp * 2    # E_l tile (bf16)
                  + 2 * tm * dp * 4    # acc_in tile (f32)
                  + 2 * tm * dp * 2    # next output tile (bf16)
                  + 2 * tm * dp * 4    # acc_out output tile (f32)
                  + tm * dp * 4)       # f32 matmul scratch
    vmem_limit = min(tile_bytes + (8 << 20), 64 << 20)

    cost = pl.CostEstimate(
        flops=2 * n_pad * n_pad * dp,
        transcendentals=0,
        bytes_accessed=(n_pad * n_pad * 2                  # adjacency stream
                        + (n_pad // tm) * n_pad * dp * 2   # E_l per row tile
                        + n_pad * dp * (4 + 2 + 4)),       # acc_in/next/acc_out
    )

    kernel = functools.partial(_lgcn_layer_kernel, inv_scale=inv_scale)
    return pl.pallas_call(
        kernel,
        out_shape=(jax.ShapeDtypeStruct((n_pad, dp), jnp.bfloat16),
                   jax.ShapeDtypeStruct((n_pad, dp), jnp.float32)),
        grid_spec=pltpu.PrefetchScalarGridSpec(
            num_scalar_prefetch=0,
            grid=grid,
            in_specs=[
                pl.BlockSpec((tm, tk), lambda i, k: (i, k)),   # A tile
                pl.BlockSpec((tk, dp), lambda i, k: (k, 0)),   # E_l tile
                pl.BlockSpec((tm, dp), lambda i, k: (i, 0)),   # running sum in
            ],
            out_specs=[
                pl.BlockSpec((tm, dp), lambda i, k: (i, 0)),   # E_{l+1}
                pl.BlockSpec((tm, dp), lambda i, k: (i, 0)),   # running sum out
            ],
            scratch_shapes=[pltpu.VMEM((tm, dp), jnp.float32)],
        ),
        compiler_params=pltpu.CompilerParams(
            dimension_semantics=("parallel", "arbitrary"),
            vmem_limit_bytes=int(vmem_limit),
        ),
        cost_estimate=cost,
    )(adj_p, cur, acc)


# ---------------------------------------------------------------------------
# Module-level wrappers.
# ---------------------------------------------------------------------------
def lgcn_all_embeddings(norm_adj, ego_embeddings, n_layers=3,
                        force_tiled=False):
    """lightgcn_all_embeddings (N, D): mean of the n_layers+1 layer outputs."""
    n, d = ego_embeddings.shape
    assert norm_adj.shape == (n, n)
    if n_layers == 0:
        return ego_embeddings.astype(jnp.float32)

    n_pad, tm, tk = _choose_tiling(n)
    dp = _round_up(max(d, 128), 128)   # lane-dense (>=128) last dim

    # Pad to tile-aligned shapes; zero padding is propagation-neutral.
    adj_p = jnp.zeros((n_pad, n_pad), jnp.bfloat16)
    adj_p = adj_p.at[:n, :n].set(norm_adj.astype(jnp.bfloat16))
    ego_p = jnp.zeros((n_pad, dp), jnp.float32)
    ego_p = ego_p.at[:n, :d].set(ego_embeddings.astype(jnp.float32))

    use_fused = (not force_tiled
                 and _fused_footprint_bytes(n_pad, dp) <= _FUSED_VMEM_BUDGET)

    if use_fused:
        acc = _lgcn_fused(adj_p, ego_p, n_layers=n_layers)
    else:
        acc = ego_p                        # f32 running sum (includes layer 0)
        cur = ego_p.astype(jnp.bfloat16)   # bf16 MXU operand
        inv = 1.0 / float(n_layers + 1)
        for layer in range(n_layers):
            scale = inv if layer == n_layers - 1 else 1.0
            cur, acc = _lgcn_layer(adj_p, cur, acc, tm=tm, tk=tk,
                                   inv_scale=scale)

    return acc[:n, :d]


def lgcn_encoder_forward(user_emb, item_emb, norm_adj, user_id, item_id,
                         n_layers=3):
    """Mirrors LGCNEncoder.forward: (u_embed, i_embed, lightgcn_all_embeddings)."""
    n_users = user_emb.shape[0]
    # TODO(synk): feed the two embedding tables separately (selecting user vs
    # item rows in the ego index_map) to avoid materializing the concat.
    ego = jnp.concatenate([user_emb, item_emb], axis=0)
    all_emb = lgcn_all_embeddings(norm_adj, ego, n_layers=n_layers)
    u_embed = jnp.take(all_emb[:n_users], user_id, axis=0)
    i_embed = jnp.take(all_emb[n_users:], item_id, axis=0)
    return u_embed, i_embed, all_emb


def _build_norm_adj(key, n_users, n_items):
    """Deterministic symmetric-normalized bipartite adjacency D^-1/2 A D^-1/2."""
    r = jax.random.bernoulli(key, p=0.3, shape=(n_users, n_items)).astype(jnp.float32)
    n = n_users + n_items
    a = jnp.zeros((n, n), dtype=jnp.float32)
    a = a.at[:n_users, n_users:].set(r)
    a = a.at[n_users:, :n_users].set(r.T)
    deg = jnp.maximum(a.sum(axis=1), 1.0)
    d_inv_sqrt = 1.0 / jnp.sqrt(deg)
    return a * d_inv_sqrt[:, None] * d_inv_sqrt[None, :]


if __name__ == "__main__":
    key = jax.random.PRNGKey(0)
    k_adj, k_user, k_item, k_uid, k_iid = jax.random.split(key, 5)

    n_users, n_items, emb_size, n_layers = 12, 20, 32, 3
    batch = 4

    norm_adj = _build_norm_adj(k_adj, n_users, n_items)
    user_emb = jax.random.normal(k_user, (n_users, emb_size), dtype=jnp.float32)
    item_emb = jax.random.normal(k_item, (n_items, emb_size), dtype=jnp.float32)
    user_id = jax.random.randint(k_uid, (batch,), 0, n_users)
    item_id = jax.random.randint(k_iid, (batch,), 0, n_items)

    # Default (fused, adjacency-resident) path.
    fwd = jax.jit(functools.partial(lgcn_encoder_forward, n_layers=n_layers))
    u_embed, i_embed, all_emb = fwd(user_emb, item_emb, norm_adj, user_id, item_id)
    jax.block_until_ready((u_embed, i_embed, all_emb))

    # Also exercise the large-graph tiled path at these small shapes.
    ego = jnp.concatenate([user_emb, item_emb], axis=0)
    all_emb_tiled = jax.jit(functools.partial(
        lgcn_all_embeddings, n_layers=n_layers, force_tiled=True))(norm_adj, ego)
    jax.block_until_ready(all_emb_tiled)

    # Reference mirroring the kernels' bf16 quantization (adjacency and the
    # matmul operand cast to bf16, f32 accumulation).
    adj_q = norm_adj.astype(jnp.bfloat16).astype(jnp.float32)
    cur, acc = ego, ego
    for _ in range(n_layers):
        cur_q = cur.astype(jnp.bfloat16).astype(jnp.float32)
        cur = jnp.dot(adj_q, cur_q, precision=jax.lax.Precision.HIGHEST)
        acc = acc + cur
    ref_all = acc / (n_layers + 1)

    assert jnp.allclose(all_emb, ref_all, rtol=2e-3, atol=2e-3), \
        "fused path: mismatch vs bf16-quantized reference"
    assert jnp.allclose(all_emb_tiled, ref_all, rtol=2e-3, atol=2e-3), \
        "tiled path: mismatch vs bf16-quantized reference"
    assert jnp.allclose(u_embed, ref_all[:n_users][user_id], rtol=2e-3, atol=2e-3)
    assert jnp.allclose(i_embed, ref_all[n_users:][item_id], rtol=2e-3, atol=2e-3)

    # Loose sanity check against the full-f32 (torch-equivalent) math.
    cur, acc = ego, ego
    for _ in range(n_layers):
        cur = jnp.dot(norm_adj, cur, precision=jax.lax.Precision.HIGHEST)
        acc = acc + cur
    ref_f32 = acc / (n_layers + 1)
    assert jnp.allclose(all_emb, ref_f32, rtol=0.1, atol=0.1), \
        "mismatch vs f32 reference (beyond bf16 tolerance)"

    print("KERNEL_OK")
</pallas_src>

<mosaic_0001>
module attributes {stable_mosaic.version = 11 : i64} {
  func.func @_lgcn_fused_kernel(%arg0: i32, %arg1: memref<128x128xbf16, #tpu.memory_space<vmem>>, %arg2: memref<128x128xf32, #tpu.memory_space<vmem>>, %arg3: memref<128x128xf32, #tpu.memory_space<vmem>>, %arg4: memref<128x128xbf16, #tpu.memory_space<vmem>>) attributes {dimension_semantics = [#tpu.dimension_semantics<arbitrary>], iteration_bounds = array<i64: 3>, scalar_prefetch = 0 : i64, scratch_operands = 1 : i64, tpu.core_type = #tpu.core_type<tc>, window_params = [{pipeline_mode = #tpu.pipeline_mode<synchronous>, transform_indices = @transform_0, window_bounds = array<i64: 128, 128>}, {pipeline_mode = #tpu.pipeline_mode<synchronous>, transform_indices = @transform_1, window_bounds = array<i64: 128, 128>}, {pipeline_mode = #tpu.pipeline_mode<synchronous>, transform_indices = @transform_2, window_bounds = array<i64: 128, 128>}]} {
    %c0_i32 = arith.constant 0 : i32
    %0 = arith.cmpi eq, %arg0, %c0_i32 : i32
    %1 = arith.extui %0 : i1 to i32
    %c0_i32_0 = arith.constant 0 : i32
    %2 = arith.cmpi ne, %1, %c0_i32_0 : i32
    scf.if %2 {
      %c0_11 = arith.constant 0 : index
      %c0_12 = arith.constant 0 : index
      %14 = vector.load %arg2[%c0_11, %c0_12] : memref<128x128xf32, #tpu.memory_space<vmem>>, vector<128x128xf32>
      %c0_13 = arith.constant 0 : index
      %c0_14 = arith.constant 0 : index
      %15 = vector.load %arg3[%c0_13, %c0_14] : memref<128x128xf32, #tpu.memory_space<vmem>>, vector<128x128xf32>
      tpu.vector_store %arg3[%c0_13, %c0_14], %14 {strides = array<i32>} : memref<128x128xf32, #tpu.memory_space<vmem>>, vector<128x128xf32>,
      %16 = arith.truncf %14 : vector<128x128xf32> to vector<128x128xbf16>
      %c0_15 = arith.constant 0 : index
      %c0_16 = arith.constant 0 : index
      %17 = vector.load %arg4[%c0_15, %c0_16] : memref<128x128xbf16, #tpu.memory_space<vmem>>, vector<128x128xbf16>
      tpu.vector_store %arg4[%c0_15, %c0_16], %16 {strides = array<i32>} : memref<128x128xbf16, #tpu.memory_space<vmem>>, vector<128x128xbf16>,
    } else {
    }
    %c0 = arith.constant 0 : index
    %c0_1 = arith.constant 0 : index
    %3 = vector.load %arg1[%c0, %c0_1] : memref<128x128xbf16, #tpu.memory_space<vmem>>, vector<128x128xbf16>
    %c0_2 = arith.constant 0 : index
    %c0_3 = arith.constant 0 : index
    %4 = vector.load %arg4[%c0_2, %c0_3] : memref<128x128xbf16, #tpu.memory_space<vmem>>, vector<128x128xbf16>
    %cst = arith.constant dense<0.000000e+00> : vector<128x128xf32>
    %5 = tpu.matmul %3, %4, %cst {dimension_numbers = #tpu.dot_dimension_numbers<[1], [0], [0], [1], [0, 0, 1, 1], [], []>} : vector<128x128xbf16>, vector<128x128xbf16>, vector<128x128xf32> -> vector<128x128xf32>
    %c0_4 = arith.constant 0 : index
    %c0_5 = arith.constant 0 : index
    %6 = vector.load %arg3[%c0_4, %c0_5] : memref<128x128xf32, #tpu.memory_space<vmem>>, vector<128x128xf32>
    %7 = arith.addf %6, %5 : vector<128x128xf32>
    %c0_6 = arith.constant 0 : index
    %c0_7 = arith.constant 0 : index
    %8 = vector.load %arg3[%c0_6, %c0_7] : memref<128x128xf32, #tpu.memory_space<vmem>>, vector<128x128xf32>
    tpu.vector_store %arg3[%c0_6, %c0_7], %7 {strides = array<i32>} : memref<128x128xf32, #tpu.memory_space<vmem>>, vector<128x128xf32>,
    %9 = arith.truncf %5 : vector<128x128xf32> to vector<128x128xbf16>
    %c0_8 = arith.constant 0 : index
    %c0_9 = arith.constant 0 : index
    %10 = vector.load %arg4[%c0_8, %c0_9] : memref<128x128xbf16, #tpu.memory_space<vmem>>, vector<128x128xbf16>
    tpu.vector_store %arg4[%c0_8, %c0_9], %9 {strides = array<i32>} : memref<128x128xbf16, #tpu.memory_space<vmem>>, vector<128x128xbf16>,
    %c2_i32 = arith.constant 2 : i32
    %11 = arith.cmpi eq, %arg0, %c2_i32 : i32
    %12 = arith.extui %11 : i1 to i32
    %c0_i32_10 = arith.constant 0 : i32
    %13 = arith.cmpi ne, %12, %c0_i32_10 : i32
    scf.if %13 {
      %c0_11 = arith.constant 0 : index
      %c0_12 = arith.constant 0 : index
      %14 = vector.load %arg3[%c0_11, %c0_12] : memref<128x128xf32, #tpu.memory_space<vmem>>, vector<128x128xf32>
      %cst_13 = arith.constant 2.500000e-01 : f32
      %15 = vector.broadcast %cst_13 : f32 to vector<128x128xf32>
      %16 = arith.mulf %14, %15 : vector<128x128xf32>
      %c0_14 = arith.constant 0 : index
      %c0_15 = arith.constant 0 : index
      %17 = vector.load %arg3[%c0_14, %c0_15] : memref<128x128xf32, #tpu.memory_space<vmem>>, vector<128x128xf32>
      tpu.vector_store %arg3[%c0_14, %c0_15], %16 {strides = array<i32>} : memref<128x128xf32, #tpu.memory_space<vmem>>, vector<128x128xf32>,
    } else {
    }
    return
  }
  func.func @transform_0(%arg0: i32) -> (i32, i32) {
    %c0_i32 = arith.constant 0 : i32
    %c0_i32_0 = arith.constant 0 : i32
    %c0_i32_1 = arith.constant 0 : i32
    return %c0_i32, %c0_i32_0 : i32, i32
  }
  func.func @transform_1(%arg0: i32) -> (i32, i32) {
    %c0_i32 = arith.constant 0 : i32
    %c0_i32_0 = arith.constant 0 : i32
    %c0_i32_1 = arith.constant 0 : i32
    return %c0_i32, %c0_i32_0 : i32, i32
  }
  func.func @transform_2(%arg0: i32) -> (i32, i32) {
    %c0_i32 = arith.constant 0 : i32
    %c0_i32_0 = arith.constant 0 : i32
    %c0_i32_1 = arith.constant 0 : i32
    return %c0_i32, %c0_i32_0 : i32, i32
  }
}

</mosaic_0001>

<bundles_post_ra>
// kernel: lgcn_encoder_forward.1
= control target key start
LH: loop header
LB: loop body
LE: loop exit
PB: predicated region body
PF: predicated region fallthrough
CT: control target
= control target key end

     0   :  { %s581_s9 = smov 0   ;;  %s908_s0 = inlined_call_operand.vmem [shape: bf16[128,128], index: 0, kind: input, shape index: {}]   ;;  %s909_s1 = inlined_call_operand.vmem [shape: f32[128,128], index: 1, kind: input, shape index: {}]   ;;  %s910_s2 = inlined_call_operand.vmem [shape: f32[128,128], index: 2, kind: output, shape index: {}]  }
   0x1 LB: > { %s463_s10 = sadd.s32 4294967295, %s564_s9   ;;  %p465_p0 = scmp.ge.s32.totalorder %s564_s9, 1  ;;  %s564_s9 = sphi %s581_s9, %s12_s9  }
   0x2   : > { %p97_p1 = scmp.lt.s32.totalorder %s564_s9, 4 }
   0x4   : > { %p98_p2 = pnand %p465_p0, %p97_p1 }
   0x5   : > { %p466_p3 = scmp.ne.s32.totalorder (!%p98_p2), %s463_s10, 0 }
   0x6   : > { %101 = sbr.rel (%p98_p2) target bundleno = 302 (0x12e), region = 28 }
   0xd   : > { %113 = sbr.rel (%p466_p3) target bundleno = 26 (0x1a), region = 32  ;;  %v114_v0 = vld [vmem:[%s909_s1] sm:$0xff] (!%p466_p3)  ;;  %v115_v1 = vld [vmem:[%s909_s1 + $0x8] sm:$0xff] (!%p466_p3)  ;;  %v116_v2 = vld [vmem:[%s909_s1 + $0x10] sm:$0xff] (!%p466_p3) }
   0xe   : > { %130 = vst [vmem:[%s910_s2] sm:$0xff] (!%p466_p3), %v114_v0  ;;  %131 = vst [vmem:[%s910_s2 + $0x8] sm:$0xff] (!%p466_p3), %v115_v1  ;;  %v117_v3 = vld [vmem:[%s909_s1 + $0x18] sm:$0xff] (!%p466_p3)  ;;  %v118_v4 = vld [vmem:[%s909_s1 + $0x20] sm:$0xff] (!%p466_p3)  ;;  %v146_v6 = vpack.c.bf16 (!%p466_p3), %v115_v1, %v114_v0 }
   0xf   : > { %132 = vst [vmem:[%s910_s2 + $0x10] sm:$0xff] (!%p466_p3), %v116_v2  ;;  %v119_v5 = vld [vmem:[%s909_s1 + $0x28] sm:$0xff] (!%p466_p3)  ;;  %133 = vst [vmem:[%s910_s2 + $0x18] sm:$0xff] (!%p466_p3), %v117_v3  ;;  %v120_v7 = vld [vmem:[%s909_s1 + $0x30] sm:$0xff] (!%p466_p3)  ;;  %v147_v10 = vpack.c.bf16 (!%p466_p3), %v117_v3, %v116_v2 }
  0x10   : > { %134 = vst [vmem:[%s910_s2 + $0x20] sm:$0xff] (!%p466_p3), %v118_v4  ;;  %135 = vst [vmem:[%s910_s2 + $0x28] sm:$0xff] (!%p466_p3), %v119_v5  ;;  %v121_v8 = vld [vmem:[%s909_s1 + $0x38] sm:$0xff] (!%p466_p3)  ;;  %v122_v9 = vld [vmem:[%s909_s1 + $0x40] sm:$0xff] (!%p466_p3)  ;;  %v148_v11 = vpack.c.bf16 (!%p466_p3), %v119_v5, %v118_v4 }
  0x11   : > { %136 = vst [vmem:[%s910_s2 + $0x30] sm:$0xff] (!%p466_p3), %v120_v7  ;;  %137 = vst [vmem:[%s910_s2 + $0x38] sm:$0xff] (!%p466_p3), %v121_v8  ;;  %v123_v12 = vld [vmem:[%s909_s1 + $0x48] sm:$0xff] (!%p466_p3)  ;;  %v124_v13 = vld [vmem:[%s909_s1 + $0x50] sm:$0xff] (!%p466_p3)  ;;  %v149_v15 = vpack.c.bf16 (!%p466_p3), %v121_v8, %v120_v7 }
  0x12   : > { %138 = vst [vmem:[%s910_s2 + $0x40] sm:$0xff] (!%p466_p3), %v122_v9  ;;  %v125_v14 = vld [vmem:[%s909_s1 + $0x58] sm:$0xff] (!%p466_p3)  ;;  %154 = vst [vmem:[#allocation2] sm:$0xff] (!%p466_p3), %v146_v6  ;;  %v126_v16 = vld [vmem:[%s909_s1 + $0x60] sm:$0xff] (!%p466_p3)  ;;  %v150_v19 = vpack.c.bf16 (!%p466_p3), %v123_v12, %v122_v9 }
  0x13   : > { %139 = vst [vmem:[%s910_s2 + $0x48] sm:$0xff] (!%p466_p3), %v123_v12  ;;  %140 = vst [vmem:[%s910_s2 + $0x50] sm:$0xff] (!%p466_p3), %v124_v13  ;;  %v127_v17 = vld [vmem:[%s909_s1 + $0x68] sm:$0xff] (!%p466_p3)  ;;  %v128_v18 = vld [vmem:[%s909_s1 + $0x70] sm:$0xff] (!%p466_p3)  ;;  %v151_v20 = vpack.c.bf16 (!%p466_p3), %v125_v14, %v124_v13 }
  0x14   : > { %141 = vst [vmem:[%s910_s2 + $0x58] sm:$0xff] %v125_v14  ;;  %155 = vst [vmem:[#allocation2 + $0x8] sm:$0xff] %v147_v10  ;;  %v129_v21 = vld [vmem:[%s909_s1 + $0x78] sm:$0xff]  ;;  %v152_v22 = vpack.c.bf16 %v127_v17, %v126_v16 }
  0x15   : > { %156 = vst [vmem:[#allocation2 + $0x10] sm:$0xff] %v148_v11  ;;  %142 = vst [vmem:[%s910_s2 + $0x60] sm:$0xff] %v126_v16  ;;  %v153_v23 = vpack.c.bf16 %v129_v21, %v128_v18 }
  0x16   : > { %143 = vst [vmem:[%s910_s2 + $0x68] sm:$0xff] %v127_v17  ;;  %144 = vst [vmem:[%s910_s2 + $0x70] sm:$0xff] %v128_v18 }
  0x17   : > { %157 = vst [vmem:[#allocation2 + $0x18] sm:$0xff] %v149_v15  ;;  %145 = vst [vmem:[%s910_s2 + $0x78] sm:$0xff] %v129_v21 }
  0x18   : > { %158 = vst [vmem:[#allocation2 + $0x20] sm:$0xff] %v150_v19  ;;  %159 = vst [vmem:[#allocation2 + $0x28] sm:$0xff] %v151_v20 }
  0x19   : > { %160 = vst [vmem:[#allocation2 + $0x30] sm:$0xff] %v152_v22  ;;  %161 = vst [vmem:[#allocation2 + $0x38] sm:$0xff] %v153_v23 }
  0x1a PF: > { %v550_v27 = vld [vmem:[%s908_s0] sm:$0xff]   ;;  %v552_v34 = vld [vmem:[%s908_s0 + $0x8] sm:$0xff]   ;;  %v554_v36 = vld [vmem:[%s908_s0 + $0x10] sm:$0xff]   ;;  %p475_p4 = scmp.ne.s32.totalorder %s463_s10, 2 }
  0x1b   : > { %v551_v28 = vld [vmem:[%s908_s0 + $0x20] sm:$0xff]   ;;  %510 = vmatprep.mubr.bf16.mxu0 %v550_v27  ;;  %v553_v35 = vld [vmem:[%s908_s0 + $0x28] sm:$0xff]   ;;  %v555_v37 = vld [vmem:[%s908_s0 + $0x30] sm:$0xff]  }
  0x1c   : > { %v180_v26 = vld [vmem:[#allocation2 + $0x10] sm:$0xff]  ;;  %518 = vmatprep.mubr.bf16.mxu1 %v551_v28  ;;  %v556_v38 = vld [vmem:[%s908_s0 + $0x18] sm:$0xff]   ;;  %v331_v42 = vld [vmem:[%s910_s2] sm:$0xff] }
  0x1d   : > { %v557_v39 = vld [vmem:[%s908_s0 + $0x38] sm:$0xff]   ;;  %v333_v40 = vld [vmem:[%s910_s2 + $0x10] sm:$0xff]  ;;  %v332_v52 = vld [vmem:[%s910_s2 + $0x8] sm:$0xff] }
  0x1e   : > { %v181_v29 = vld [vmem:[#allocation2 + $0x18] sm:$0xff]  ;;  %v337_v4 = vld [vmem:[%s910_s2 + $0x30] sm:$0xff]  ;;  %v335_v6 = vld [vmem:[%s910_s2 + $0x20] sm:$0xff] }
  0x1f   : > { %v178_v24 = vld [vmem:[#allocation2] sm:$0xff]  ;;  %v183_v31 = vld [vmem:[#allocation2 + $0x28] sm:$0xff]  ;;  %v334_v46 = vld [vmem:[%s910_s2 + $0x18] sm:$0xff] }
  0x20   : > { %494 = vmatprep.subr.bf16.mxu0 %v178_v24  ;;  %526 = vmatprep.subr.bf16.mxu1 %v178_v24  ;;  %v182_v30 = vld [vmem:[#allocation2 + $0x20] sm:$0xff]  ;;  %v184_v32 = vld [vmem:[#allocation2 + $0x30] sm:$0xff]  ;;  %v185_v33 = vld [vmem:[#allocation2 + $0x38] sm:$0xff] }
  0x21   : > { %v179_v25 = vld [vmem:[#allocation2 + $0x8] sm:$0xff]  ;;  %495 = vmatpush3.bf16.msra.mxu0 %v178_v24  ;;  %534 = vmatpush3.bf16.msra.mxu1 %v178_v24  ;;  %v341_v41 = vld [vmem:[%s910_s2 + $0x50] sm:$0xff]  ;;  %v339_v43 = vld [vmem:[%s910_s2 + $0x40] sm:$0xff] }
  0x22   : > { %496 = vmatprep.subr.bf16.mxu0 %v179_v25  ;;  %527 = vmatprep.subr.bf16.mxu1 %v179_v25  ;;  %v342_v47 = vld [vmem:[%s910_s2 + $0x58] sm:$0xff]  ;;  %v340_v53 = vld [vmem:[%s910_s2 + $0x48] sm:$0xff]  ;;  %v345_v5 = vld [vmem:[%s910_s2 + $0x70] sm:$0xff] }
  0x23   : > { %v343_v7 = vld [vmem:[%s910_s2 + $0x60] sm:$0xff]  ;;  %v338_v10 = vld [vmem:[%s910_s2 + $0x38] sm:$0xff]  ;;  %v336_v16 = vld [vmem:[%s910_s2 + $0x28] sm:$0xff] }
  0x24   : > { %v346_v11 = vld [vmem:[%s910_s2 + $0x78] sm:$0xff]  ;;  %v344_v17 = vld [vmem:[%s910_s2 + $0x68] sm:$0xff] }
  0x25   : > { %497 = vmatpush3.bf16.msra.mxu0 %v179_v25  ;;  %535 = vmatpush3.bf16.msra.mxu1 %v179_v25 }
  0x26   : > { %498 = vmatprep.subr.bf16.mxu0 %v180_v26  ;;  %528 = vmatprep.subr.bf16.mxu1 %v180_v26 }
  0x29   : > { %499 = vmatpush3.bf16.msra.mxu0 %v180_v26  ;;  %536 = vmatpush3.bf16.msra.mxu1 %v180_v26 }
  0x2a   : > { %500 = vmatprep.subr.bf16.mxu0 %v181_v29  ;;  %529 = vmatprep.subr.bf16.mxu1 %v181_v29 }
  0x2d   : > { %501 = vmatpush3.bf16.msra.mxu0 %v181_v29  ;;  %537 = vmatpush3.bf16.msra.mxu1 %v181_v29 }
  0x2e   : > { %502 = vmatprep.subr.bf16.mxu0 %v182_v30  ;;  %530 = vmatprep.subr.bf16.mxu1 %v182_v30 }
  0x31   : > { %503 = vmatpush3.bf16.msra.mxu0 %v182_v30  ;;  %538 = vmatpush3.bf16.msra.mxu1 %v182_v30 }
  0x32   : > { %504 = vmatprep.subr.bf16.mxu0 %v183_v31  ;;  %531 = vmatprep.subr.bf16.mxu1 %v183_v31 }
  0x35   : > { %505 = vmatpush3.bf16.msra.mxu0 %v183_v31  ;;  %539 = vmatpush3.bf16.msra.mxu1 %v183_v31 }
  0x36   : > { %506 = vmatprep.subr.bf16.mxu0 %v184_v32  ;;  %532 = vmatprep.subr.bf16.mxu1 %v184_v32 }
  0x39   : > { %507 = vmatpush3.bf16.msra.mxu0 %v184_v32  ;;  %540 = vmatpush3.bf16.msra.mxu1 %v184_v32 }
  0x3a   : > { %508 = vmatprep.subr.bf16.mxu0 %v185_v33  ;;  %533 = vmatprep.subr.bf16.mxu1 %v185_v33 }
  0x3d   : > { %509 = vmatpush3.bf16.msra.mxu0 %v185_v33  ;;  %541 = vmatpush3.bf16.msra.mxu1 %v185_v33 }
  0x40   : > { %511 = vmatmul.mubr.bf16.vlgmr.msra.gmra.mrb[0].mxu0 %v552_v34  ;;  %519 = vmatmul.mubr.bf16.vlgmr.msra.gmra.mrb[0].mxu1 %v553_v35 }
  0x41   : > { %514 = vmatprep.mubr.bf16.mxu0 %v554_v36  ;;  %522 = vmatprep.mubr.bf16.mxu1 %v555_v37 }
  0x48   : > { %515 = vmatmul.mubr.bf16.gmra.mrb[4].mxu0 %v556_v38  ;;  %523 = vmatmul.mubr.bf16.gmra.mrb[4].mxu1 %v557_v39 }
 0x113   : > { %v512_v44 = vpop.f32.mrb[0].mxu0  ;;  %v520_v45 = vpop.f32.mrb[0].mxu1 }
 0x114   : > { %v349_v48 = vadd.f32 %v512_v44, %v333_v40  ;;  %v357_v49 = vadd.f32 %v520_v45, %v341_v41  ;;  %v268_v50 = vpop.f32.mrb[1].mxu0  ;;  %v300_v51 = vpop.f32.mrb[1].mxu1 }
 0x115   : > { %v347_v54 = vadd.f32 %v331_v42, %v268_v50  ;;  %v355_v55 = vadd.f32 %v339_v43, %v300_v51  ;;  %v513_v56 = vpop.f32.mrb[2].mxu0  ;;  %v521_v57 = vpop.f32.mrb[2].mxu1 }
 0x116   : > { %365 = vst [vmem:[%s910_s2 + $0x10] sm:$0xff] %v349_v48  ;;  %373 = vst [vmem:[%s910_s2 + $0x50] sm:$0xff] %v357_v49  ;;  %v350_v58 = vadd.f32 %v513_v56, %v334_v46  ;;  %v380_v59 = vpack.c.bf16 %v513_v56, %v512_v44  ;;  %v358_v60 = vadd.f32 %v521_v57, %v342_v47  ;;  %v271_v62 = vpop.f32.mrb[3].mxu0  ;;  %v303_v63 = vpop.f32.mrb[3].mxu1 }
 0x117   : > { %v384_v61 = vpack.c.bf16 %v521_v57, %v520_v45  ;;  %363 = vst [vmem:[%s910_s2] sm:$0xff] %v347_v54  ;;  %371 = vst [vmem:[%s910_s2 + $0x40] sm:$0xff] %v355_v55  ;;  %v348_v0 = vadd.f32 %v332_v52, %v271_v62  ;;  %v379_v1 = vpack.c.bf16 %v271_v62, %v268_v50 }
 0x118   : > { %v356_v2 = vadd.f32 %v340_v53, %v303_v63  ;;  %v383_v3 = vpack.c.bf16 %v303_v63, %v300_v51  ;;  %366 = vst [vmem:[%s910_s2 + $0x18] sm:$0xff] %v350_v58  ;;  %388 = vst [vmem:[#allocation2 + $0x8] sm:$0xff] %v380_v59 }
 0x119   : > { %374 = vst [vmem:[%s910_s2 + $0x58] sm:$0xff] %v358_v60  ;;  %392 = vst [vmem:[#allocation2 + $0x28] sm:$0xff] %v384_v61 }
 0x11a   : > { %364 = vst [vmem:[%s910_s2 + $0x8] sm:$0xff] %v348_v0  ;;  %387 = vst [vmem:[#allocation2] sm:$0xff] %v379_v1 }
 0x11b   : > { %372 = vst [vmem:[%s910_s2 + $0x48] sm:$0xff] %v356_v2  ;;  %391 = vst [vmem:[#allocation2 + $0x20] sm:$0xff] %v383_v3  ;;  %v516_v8 = vpop.f32.mrb[4].mxu0  ;;  %v524_v9 = vpop.f32.mrb[4].mxu1 }
 0x11c   : > { %v353_v12 = vadd.f32 %v516_v8, %v337_v4  ;;  %v361_v13 = vadd.f32 %v524_v9, %v345_v5  ;;  %v284_v14 = vpop.f32.mrb[5].mxu0  ;;  %v316_v15 = vpop.f32.mrb[5].mxu1 }
 0x11d   : > { %v351_v18 = vadd.f32 %v335_v6, %v284_v14  ;;  %v359_v19 = vadd.f32 %v343_v7, %v316_v15  ;;  %v517_v20 = vpop.f32.mrb[6].mxu0  ;;  %v525_v21 = vpop.f32.mrb[6].mxu1  ;;  %398 = sbr.rel (%p475_p4) target bundleno = 302 (0x12e), region = 36  ;;  %v401_v34 = vld [vmem:[%s910_s2 + $0x10] sm:$0xff] (!%p475_p4) }
 0x11e   : > { %369 = vst [vmem:[%s910_s2 + $0x30] sm:$0xff] %v353_v12  ;;  %377 = vst [vmem:[%s910_s2 + $0x70] sm:$0xff] %v361_v13  ;;  %v354_v22 = vadd.f32 %v517_v20, %v338_v10  ;;  %v382_v23 = vpack.c.bf16 %v517_v20, %v516_v8  ;;  %v362_v24 = vadd.f32 %v525_v21, %v346_v11  ;;  %v287_v26 = vpop.f32.mrb[7].mxu0  ;;  %v319_v27 = vpop.f32.mrb[7].mxu1  ;;  %v399_v32 = vld [vmem:[%s910_s2] sm:$0xff] (!%p475_p4)  ;;  %v417_v37 = vmul.f32 (!%p475_p4), 0.25, %v401_v34 }
 0x11f   : > { %v386_v25 = vpack.c.bf16 %v525_v21, %v524_v9  ;;  %367 = vst [vmem:[%s910_s2 + $0x20] sm:$0xff] %v351_v18  ;;  %375 = vst [vmem:[%s910_s2 + $0x60] sm:$0xff] %v359_v19  ;;  %v352_v28 = vadd.f32 %v336_v16, %v287_v26  ;;  %v381_v29 = vpack.c.bf16 %v287_v26, %v284_v14  ;;  %v415_v35 = vmul.f32 (!%p475_p4), 0.25, %v399_v32  ;;  %v402_v38 = vld [vmem:[%s910_s2 + $0x18] sm:$0xff] (!%p475_p4)  ;;  %v407_v46 = vld [vmem:[%s910_s2 + $0x40] sm:$0xff] (!%p475_p4) }
 0x120   : > { %v360_v30 = vadd.f32 %v344_v17, %v319_v27  ;;  %v385_v31 = vpack.c.bf16 %v319_v27, %v316_v15  ;;  %370 = vst [vmem:[%s910_s2 + $0x38] sm:$0xff] %v354_v22  ;;  %390 = vst [vmem:[#allocation2 + $0x18] sm:$0xff] %v382_v23  ;;  %v418_v41 = vmul.f32 (!%p475_p4), 0.25, %v402_v38  ;;  %v423_v49 = vmul.f32 (!%p475_p4), 0.25, %v407_v46  ;;  %v409_v51 = vld [vmem:[%s910_s2 + $0x50] sm:$0xff] (!%p475_p4)  ;;  %v410_v52 = vld [vmem:[%s910_s2 + $0x58] sm:$0xff] (!%p475_p4) }
 0x121   : > { %378 = vst [vmem:[%s910_s2 + $0x78] sm:$0xff] %v362_v24  ;;  %394 = vst [vmem:[#allocation2 + $0x38] sm:$0xff] %v386_v25  ;;  %v400_v33 = vld [vmem:[%s910_s2 + $0x8] sm:$0xff] (!%p475_p4)  ;;  %v425_v54 = vmul.f32 (!%p475_p4), 0.25, %v409_v51  ;;  %v426_v55 = vmul.f32 (!%p475_p4), 0.25, %v410_v52 }
 0x122   : > { %368 = vst [vmem:[%s910_s2 + $0x28] sm:$0xff] %v352_v28  ;;  %389 = vst [vmem:[#allocation2 + $0x10] sm:$0xff] %v381_v29  ;;  %v416_v36 = vmul.f32 (!%p475_p4), 0.25, %v400_v33  ;;  %v408_v50 = vld [vmem:[%s910_s2 + $0x48] sm:$0xff] (!%p475_p4) }
 0x123   : > { %376 = vst [vmem:[%s910_s2 + $0x68] sm:$0xff] %v360_v30  ;;  %393 = vst [vmem:[#allocation2 + $0x30] sm:$0xff] %v385_v31  ;;  %v424_v53 = vmul.f32 (!%p475_p4), 0.25, %v408_v50 }
 0x124   : > { %431 = vst [vmem:[%s910_s2] sm:$0xff] %v415_v35  ;;  %432 = vst [vmem:[%s910_s2 + $0x8] sm:$0xff] %v416_v36 }
 0x125   : > { %v405_v44 = vld [vmem:[%s910_s2 + $0x30] sm:$0xff]  ;;  %433 = vst [vmem:[%s910_s2 + $0x10] sm:$0xff] %v417_v37  ;;  %434 = vst [vmem:[%s910_s2 + $0x18] sm:$0xff] %v418_v41 }
 0x126   : > { %v403_v39 = vld [vmem:[%s910_s2 + $0x20] sm:$0xff]  ;;  %v421_v47 = vmul.f32 0.25, %v405_v44  ;;  %v413_v58 = vld [vmem:[%s910_s2 + $0x70] sm:$0xff]  ;;  %439 = vst [vmem:[%s910_s2 + $0x40] sm:$0xff] %v423_v49  ;;  %440 = vst [vmem:[%s910_s2 + $0x48] sm:$0xff] %v424_v53 }
 0x127   : > { %v419_v42 = vmul.f32 0.25, %v403_v39  ;;  %v406_v45 = vld [vmem:[%s910_s2 + $0x38] sm:$0xff]  ;;  %v411_v56 = vld [vmem:[%s910_s2 + $0x60] sm:$0xff]  ;;  %v429_v61 = vmul.f32 0.25, %v413_v58  ;;  %441 = vst [vmem:[%s910_s2 + $0x50] sm:$0xff] %v425_v54  ;;  %442 = vst [vmem:[%s910_s2 + $0x58] sm:$0xff] %v426_v55 }
 0x128   : > { %v422_v48 = vmul.f32 0.25, %v406_v45  ;;  %437 = vst [vmem:[%s910_s2 + $0x30] sm:$0xff] %v421_v47  ;;  %v427_v59 = vmul.f32 0.25, %v411_v56  ;;  %v414_v62 = vld [vmem:[%s910_s2 + $0x78] sm:$0xff] }
 0x129   : > { %v404_v40 = vld [vmem:[%s910_s2 + $0x28] sm:$0xff]  ;;  %435 = vst [vmem:[%s910_s2 + $0x20] sm:$0xff] %v419_v42  ;;  %v430_v63 = vmul.f32 0.25, %v414_v62  ;;  %445 = vst [vmem:[%s910_s2 + $0x70] sm:$0xff] %v429_v61 }
 0x12a   : > { %v420_v43 = vmul.f32 0.25, %v404_v40  ;;  %v412_v57 = vld [vmem:[%s910_s2 + $0x68] sm:$0xff]  ;;  %438 = vst [vmem:[%s910_s2 + $0x38] sm:$0xff] %v422_v48  ;;  %443 = vst [vmem:[%s910_s2 + $0x60] sm:$0xff] %v427_v59 }
 0x12b   : > { %v428_v60 = vmul.f32 0.25, %v412_v57  ;;  %446 = vst [vmem:[%s910_s2 + $0x78] sm:$0xff] %v430_v63 }
 0x12c   : > { %436 = vst [vmem:[%s910_s2 + $0x28] sm:$0xff] %v420_v43 }
 0x12d   : > { %444 = vst [vmem:[%s910_s2 + $0x68] sm:$0xff] %v428_v60 }
 0x12e PF: > { %s12_s9 = sadd.s32 1, %s564_s9  }
 0x12f   : > { %p9_p5 = scmp.ge.s32.totalorder %s12_s9, 5  }
 0x131   :  { %11 = sbr.rel (!%p9_p5) target bundleno = 1 (0x1), region = 59 }

</bundles_post_ra>
